<compile_context>
chip_gen: v6e
topology: v6e:2x2x1
jax: 0.10.0
libtpu: 0.0.40
codegen_flags: <defaults>
</compile_context>

<pallas_src>
import jax
import jax.numpy as jnp
from jax.experimental import pallas as pl
from jax.experimental.pallas import tpu as pltpu

HIDDEN = 256
LANE = 128  # pad the tiny num_actions output dim to one full lane width


def mlp_kernel(x_ref, w1_ref, b1_ref, w2_ref, b2_ref, o_ref):
    # x: (TB, D) bf16, w1: (D, H) bf16, b1: (1, H) f32,
    # w2: (H, A_pad) bf16, b2: (1, A_pad) f32, o: (TB, A_pad) f32
    x = x_ref[...]
    h = jnp.dot(x, w1_ref[...], preferred_element_type=jnp.float32) + b1_ref[...]
    h = jnp.maximum(h, 0.0).astype(jnp.bfloat16)
    out = jnp.dot(h, w2_ref[...], preferred_element_type=jnp.float32) + b2_ref[...]
    o_ref[...] = out.astype(o_ref.dtype)


def prepare_params(w1, b1, w2, b2):
    """One-time param prep: bf16 weights, f32 biases, output dim padded to 128 lanes."""
    H, A = w2.shape
    a_pad = max(LANE, ((A + LANE - 1) // LANE) * LANE)
    w1b = w1.astype(jnp.bfloat16)
    b1f = b1.reshape(1, -1).astype(jnp.float32)
    w2b = jnp.zeros((H, a_pad), jnp.bfloat16).at[:, :A].set(w2.astype(jnp.bfloat16))
    b2f = jnp.zeros((1, a_pad), jnp.float32).at[:, :A].set(
        b2.reshape(1, -1).astype(jnp.float32))
    return w1b, b1f, w2b, b2f


def mlp_forward(x, w1b, b1f, w2b, b2f, num_actions, *, block_b=256):
    B, D = x.shape
    H = w1b.shape[1]
    a_pad = w2b.shape[1]
    xb = x.astype(jnp.bfloat16)

    if B <= block_b:
        # Small batch: single full-array block in VMEM, no grid / no pipeline.
        out = pl.pallas_call(
            mlp_kernel,
            out_shape=jax.ShapeDtypeStruct((B, a_pad), jnp.float32),
            in_specs=[pl.BlockSpec(memory_space=pltpu.MemorySpace.VMEM)] * 5,
            out_specs=pl.BlockSpec(memory_space=pltpu.MemorySpace.VMEM),
        )(xb, w1b, b1f, w2b, b2f)
        return out[:B, :num_actions].astype(x.dtype)

    # Large batch: tile the batch dim; weights are grid-invariant (DMA'd once).
    b_pad = ((B + block_b - 1) // block_b) * block_b
    if b_pad != B:
        xb = jnp.pad(xb, ((0, b_pad - B), (0, 0)))
    grid = (b_pad // block_b,)
    out = pl.pallas_call(
        mlp_kernel,
        out_shape=jax.ShapeDtypeStruct((b_pad, a_pad), jnp.float32),
        grid=grid,
        in_specs=[
            pl.BlockSpec((block_b, D), lambda i: (i, 0)),
            pl.BlockSpec((D, H), lambda i: (0, 0)),
            pl.BlockSpec((1, H), lambda i: (0, 0)),
            pl.BlockSpec((H, a_pad), lambda i: (0, 0)),
            pl.BlockSpec((1, a_pad), lambda i: (0, 0)),
        ],
        out_specs=pl.BlockSpec((block_b, a_pad), lambda i: (i, 0)),
        compiler_params=pltpu.CompilerParams(
            dimension_semantics=("parallel",),  # batch tiles shard across TCs on v7x
        ),
    )(xb, w1b, b1f, w2b, b2f)
    return out[:B, :num_actions].astype(x.dtype)


def ref_forward(x, w1, b1, w2, b2):
    # Pure-JAX reference mirroring the kernel's bf16-matmul / f32-accumulate path.
    xb = x.astype(jnp.bfloat16)
    h = jnp.dot(xb, w1.astype(jnp.bfloat16),
                preferred_element_type=jnp.float32) + b1.reshape(1, -1)
    h = jnp.maximum(h, 0.0).astype(jnp.bfloat16)
    return jnp.dot(h, w2.astype(jnp.bfloat16),
                   preferred_element_type=jnp.float32) + b2.reshape(1, -1)


if __name__ == "__main__":
    # Module config: obs_shape = (32,), num_actions = 4
    obs_dim = 32
    num_actions = 4

    key = jax.random.PRNGKey(0)
    kx, kx2, k1, kb1, k2, kb2 = jax.random.split(key, 6)

    # PyTorch Linear default init: U(-1/sqrt(in), 1/sqrt(in)).
    lim1 = 1.0 / jnp.sqrt(jnp.float32(obs_dim))
    w1 = jax.random.uniform(k1, (obs_dim, HIDDEN), minval=-lim1, maxval=lim1,
                            dtype=jnp.float32)
    b1 = jax.random.uniform(kb1, (HIDDEN,), minval=-lim1, maxval=lim1,
                            dtype=jnp.float32)
    lim2 = 1.0 / jnp.sqrt(jnp.float32(HIDDEN))
    w2 = jax.random.uniform(k2, (HIDDEN, num_actions), minval=-lim2, maxval=lim2,
                            dtype=jnp.float32)
    b2 = jax.random.uniform(kb2, (num_actions,), minval=-lim2, maxval=lim2,
                            dtype=jnp.float32)

    w1b, b1f, w2b, b2f = prepare_params(w1, b1, w2, b2)

    # Small-batch path (gridless, single VMEM block).
    x_small = jax.random.normal(kx, (8, obs_dim), dtype=jnp.float32)
    out_small = jax.block_until_ready(
        mlp_forward(x_small, w1b, b1f, w2b, b2f, num_actions))
    ref_small = ref_forward(x_small, w1, b1, w2, b2)
    assert out_small.shape == (8, num_actions)
    assert jnp.allclose(out_small, ref_small, rtol=1e-3, atol=1e-3)

    # Large-batch path (batch-tiled grid, "parallel" over batch tiles).
    x_big = jax.random.normal(kx2, (512, obs_dim), dtype=jnp.float32)
    out_big = jax.block_until_ready(
        mlp_forward(x_big, w1b, b1f, w2b, b2f, num_actions, block_b=256))
    ref_big = ref_forward(x_big, w1, b1, w2, b2)
    assert out_big.shape == (512, num_actions)
    assert jnp.allclose(out_big, ref_big, rtol=1e-3, atol=1e-3)

    print("KERNEL_OK")
</pallas_src>

<mosaic_0001>
module attributes {stable_mosaic.version = 11 : i64} {
  func.func @mlp_kernel(%arg0: memref<8x32xbf16, #tpu.memory_space<vmem>>, %arg1: memref<32x256xbf16, #tpu.memory_space<vmem>>, %arg2: memref<1x256xf32, #tpu.memory_space<vmem>>, %arg3: memref<256x128xbf16, #tpu.memory_space<vmem>>, %arg4: memref<1x128xf32, #tpu.memory_space<vmem>>, %arg5: memref<8x128xf32, #tpu.memory_space<vmem>>) attributes {dimension_semantics = [], scalar_prefetch = 0 : i64, scratch_operands = 0 : i64, tpu.core_type = #tpu.core_type<tc>} {
    %c0 = arith.constant 0 : index
    %c0_0 = arith.constant 0 : index
    %0 = vector.load %arg0[%c0, %c0_0] : memref<8x32xbf16, #tpu.memory_space<vmem>>, vector<8x32xbf16>
    %c0_1 = arith.constant 0 : index
    %c0_2 = arith.constant 0 : index
    %1 = vector.load %arg1[%c0_1, %c0_2] : memref<32x256xbf16, #tpu.memory_space<vmem>>, vector<32x256xbf16>
    %cst = arith.constant dense<0.000000e+00> : vector<8x256xf32>
    %2 = tpu.matmul %0, %1, %cst {dimension_numbers = #tpu.dot_dimension_numbers<[1], [0], [0], [1], [0, 0, 1, 1], [], []>} : vector<8x32xbf16>, vector<32x256xbf16>, vector<8x256xf32> -> vector<8x256xf32>
    %c0_3 = arith.constant 0 : index
    %c0_4 = arith.constant 0 : index
    %3 = vector.load %arg2[%c0_3, %c0_4] : memref<1x256xf32, #tpu.memory_space<vmem>>, vector<1x256xf32>
    %4 = vector.broadcast %3 : vector<1x256xf32> to vector<8x256xf32>
    %5 = arith.addf %2, %4 : vector<8x256xf32>
    %cst_5 = arith.constant 0.000000e+00 : f32
    %6 = vector.broadcast %cst_5 : f32 to vector<8x256xf32>
    %7 = arith.maximumf %5, %6 : vector<8x256xf32>
    %8 = arith.truncf %7 : vector<8x256xf32> to vector<8x256xbf16>
    %c0_6 = arith.constant 0 : index
    %c0_7 = arith.constant 0 : index
    %9 = vector.load %arg3[%c0_6, %c0_7] : memref<256x128xbf16, #tpu.memory_space<vmem>>, vector<256x128xbf16>
    %cst_8 = arith.constant dense<0.000000e+00> : vector<8x128xf32>
    %10 = tpu.matmul %8, %9, %cst_8 {dimension_numbers = #tpu.dot_dimension_numbers<[1], [0], [0], [1], [0, 0, 1, 1], [], []>} : vector<8x256xbf16>, vector<256x128xbf16>, vector<8x128xf32> -> vector<8x128xf32>
    %c0_9 = arith.constant 0 : index
    %c0_10 = arith.constant 0 : index
    %11 = vector.load %arg4[%c0_9, %c0_10] : memref<1x128xf32, #tpu.memory_space<vmem>>, vector<1x128xf32>
    %12 = vector.broadcast %11 : vector<1x128xf32> to vector<8x128xf32>
    %13 = arith.addf %10, %12 : vector<8x128xf32>
    %c0_11 = arith.constant 0 : index
    %c0_12 = arith.constant 0 : index
    %14 = vector.load %arg5[%c0_11, %c0_12] : memref<8x128xf32, #tpu.memory_space<vmem>>, vector<8x128xf32>
    tpu.vector_store %arg5[%c0_11, %c0_12], %13 {strides = array<i32>} : memref<8x128xf32, #tpu.memory_space<vmem>>, vector<8x128xf32>,
    return
  }
}

</mosaic_0001>

<bundles_post_ra>
// kernel: tpu_custom_call.1
= control target key start
LH: loop header
LB: loop body
LE: loop exit
PB: predicated region body
PF: predicated region fallthrough
CT: control target
= control target key end

     0   :  { %10 = vsyncpa [#allocation3], 0  ;;  %s557_s0 = inlined_call_operand.hbm [shape: bf16[8,32], index: 0, kind: input, shape index: {}]   ;;  %s558_s1 = inlined_call_operand.hbm [shape: bf16[32,256], index: 1, kind: input, shape index: {}]   ;;  %s559_s2 = inlined_call_operand.vmem [shape: f32[1,256], index: 2, kind: input, shape index: {}]   ;;  %s560_s3 = inlined_call_operand.hbm [shape: bf16[256,128], index: 3, kind: input, shape index: {}]   ;;  %s561_s4 = inlined_call_operand.vmem [shape: f32[1,128], index: 4, kind: input, shape index: {}]   ;;  %s562_s5 = inlined_call_operand.hbm [shape: f32[8,128], index: 5, kind: output, shape index: {}]  }
   0x1   :  { %11 = vsyncpa [#allocation6], 0 }
   0x2   :  { %12 = vsyncpa [#allocation4], 0  ;;  %s500_s18 = smov [#allocation5]  }
   0x3   :  { %s28_s19 = sshll.u32 %s500_s18, 4  ;;  %s29_s19 = int_to_ptr.vmem [resolvable:$true] %s28_s19 }
   0x4   :  { %s422_s20 = scalar_lea.vmem %s29_s19, 512  ;;  %p427_p1 = scmp.lt.s32.totalorder %s29_s19, %s29_s19 }
   0x5   :  { %p423_p0 = scmp.ne.s32.totalorder %s29_s19, %s422_s20  ;;  %p428_p2 = scmp.lt.s32.totalorder %s422_s20, %s422_s20 }
   0x7   :  { %p429_p3 = por %p428_p2, %p427_p1 }
   0x9   :  { %p430_p4 = pnand %p429_p3, %p423_p0 }
   0xb   :  { %433 = shalt.err (!%p430_p4)
}
   0xc   :  { %s501_s21 = smov 128   ;;  %s502_s22 = smov 8  }
   0xd   :  { %34 = dma.hbm_to_vmem [thread:$0]  %s558_s1, 512, %s29_s19, [#allocation6], %s501_s21, %s501_s21, %s502_s22  }
   0xe   :  { %s503_s25 = smov [#allocation2]   ;;  %s504_s27 = smov [#allocation7]  }
   0xf   :  { %s19_s26 = sshll.u32 %s503_s25, 4  ;;  %s42_s28 = sshll.u32 %s504_s27, 4  ;;  %s20_s26 = int_to_ptr.vmem [resolvable:$true] %s19_s26  ;;  %s43_s28 = int_to_ptr.vmem [resolvable:$true] %s42_s28 }
  0x10   :  { %s442_s29 = scalar_lea.vmem %s20_s26, 64  ;;  %p447_p6 = scmp.lt.s32.totalorder %s20_s26, %s20_s26 }
  0x11   :  { %p443_p5 = scmp.ne.s32.totalorder %s20_s26, %s442_s29  ;;  %p448_p7 = scmp.lt.s32.totalorder %s442_s29, %s442_s29 }
  0x13   :  { %p449_p8 = por %p448_p7, %p447_p6 }
  0x15   :  { %p450_p9 = pnand %p449_p8, %p443_p5 }
  0x17   :  { %453 = shalt.err (!%p450_p9)
}
  0x18   :  { %22 = dma.hbm_to_vmem [thread:$0]  %s557_s0, 64, %s20_s26, [#allocation3]  }
  0x19   :  { %s462_s7 = scalar_lea.vmem %s43_s28, 2048  ;;  %p467_p11 = scmp.lt.s32.totalorder %s43_s28, %s43_s28 }
  0x1a   :  { %p463_p10 = scmp.ne.s32.totalorder %s43_s28, %s462_s7  ;;  %p468_p12 = scmp.lt.s32.totalorder %s462_s7, %s462_s7 }
  0x1c   :  { %p469_p13 = por %p468_p12, %p467_p11 }
  0x1e   :  { %p470_p0 = pnand %p469_p13, %p463_p10 }
  0x20   :  { %473 = shalt.err (!%p470_p0)
}
  0x21   :  { %s505_s1 = smov 64   ;;  %s506_s8 = smov 4  }
  0x22   :  { %48 = dma.hbm_to_vmem [thread:$0]  %s560_s3, 2048, %s43_s28, [#allocation6], %s505_s1, %s505_s1, %s506_s8  }
  0x23   :  { %494 = dma.done.wait [#allocation3], 64  }
  0x24   :  { %495 = vsyncadd [#allocation3], 4294967232 }
  0x25   :  { %496 = dma.done.wait [#allocation6], 2560  }
  0x26   :  { %497 = vsyncadd [#allocation6], 4294964736  ;;  %v507_v0 = vmov 0   ;;  %v392_v1 = vld [vmem:[#allocation5 + $0x14] ss:$8 sps:$4 sm:$0xff]   ;;  %vm98_vm0 = vcmask 261120   ;;  %v68_v22 = vlaneseq }
  0x27   :  { %134 = vmatprep.mubr.bf16.mxu0 %v507_v0  ;;  %v394_v2 = vld [vmem:[#allocation5 + $0x10] ss:$8 sps:$4 sm:$0xff]   ;;  %114 = vmatprep.subr.bf16.mxu0 %v392_v1  ;;  %v395_v3 = vld [vmem:[#allocation5 + $0x4] ss:$8 sps:$4 sm:$0xff]   ;;  %v397_v4 = vld [vmem:[#allocation5] ss:$8 sps:$4 sm:$0xff]  }
  0x28   :  { %115 = vmatpush1.bf16.msra.mxu0 %v394_v2  ;;  %v398_v5 = vld [vmem:[#allocation7 + $0x78] sm:$0xff]   ;;  %v400_v8 = vld [vmem:[#allocation7 + $0x70] sm:$0xff]   ;;  %v402_v10 = vld [vmem:[#allocation7 + $0x68] sm:$0xff]   ;;  %v69_v23 = vshrl.u32 %v68_v22, 7 }
  0x29   :  { %116 = vmatprep.subr.bf16.mxu0 %v395_v3  ;;  %v399_v6 = vld [vmem:[#allocation7 + $0x38] sm:$0xff]   ;;  %361 = vmatprep.subr.bf16.mxu1 %v398_v5  ;;  %v401_v9 = vld [vmem:[#allocation7 + $0x30] sm:$0xff]   ;;  %v403_v11 = vld [vmem:[#allocation7 + $0x28] sm:$0xff]  }
  0x2a   :  { %v61_v7 = vld [vmem:[#allocation2] sm:$0xf]  ;;  %362 = vmatpush3.bf16.msra.mxu1 %v399_v6  ;;  %v404_v12 = vld [vmem:[#allocation7 + $0x60] sm:$0xff]   ;;  %v408_v16 = vld [vmem:[#allocation7 + $0x50] sm:$0xff]   ;;  %v70_v24 = vsub.s32 0, %v69_v23  ;;  %v74_v26 = vsub.s32 1, %v69_v23 }
  0x2b   :  { %363 = vmatprep.subr.bf16.mxu1 %v400_v8  ;;  %v405_v13 = vld [vmem:[#allocation7 + $0x20] sm:$0xff]   ;;  %v406_v14 = vld [vmem:[#allocation7 + $0x58] sm:$0xff]   ;;  %v409_v17 = vld [vmem:[#allocation7 + $0x10] sm:$0xff]  }
  0x2c   :  { %117 = vmatpush1.bf16.msra.mxu0 %v397_v4  ;;  %v407_v15 = vld [vmem:[#allocation7 + $0x18] sm:$0xff]   ;;  %v410_v18 = vld [vmem:[#allocation7 + $0x48] sm:$0xff]   ;;  %v412_v20 = vld [vmem:[#allocation7 + $0x40] sm:$0xff]  }
  0x2d   :  { %v411_v19 = vld [vmem:[#allocation7 + $0x8] sm:$0xff]   ;;  %v413_v21 = vld [vmem:[#allocation7] sm:$0xff]   ;;  %v66_v25 = vld [vmem:[%s559_s2] sm:$0x3]  ;;  %s508_s2 = smov [#allocation8]  }
  0x2e   :  { %364 = vmatpush3.bf16.msra.mxu1 %v401_v9  ;;  %v71_v27 = vrot.slane %v66_v25, %v70_v24  ;;  %v75_v28 = vrot.slane %v66_v25, %v74_v26  ;;  %v344_v40 = vld [vmem:[%s561_s4] ss:$0 sm:$0xff]  ;;  %s329_s13 = sshll.u32 %s508_s2, 4  ;;  %s330_s13 = int_to_ptr.vmem [resolvable:$true] %s329_s13 }
  0x2f   :  { %343 = vmatmul.mubr.msk.bf16.vlgmr.msra.gmra.mxu0 %vm98_vm0, %v61_v7  ;;  %365 = vmatprep.subr.bf16.mxu1 %v402_v10  ;;  %s474_s14 = scalar_lea.vmem %s330_s13, 128  ;;  %p479_p2 = scmp.lt.s32.totalorder %s330_s13, %s330_s13 }
  0x30   :  { %p475_p1 = scmp.ne.s32.totalorder %s330_s13, %s474_s14  ;;  %p480_p3 = scmp.lt.s32.totalorder %s474_s14, %s474_s14 }
  0x32   :  { %366 = vmatpush3.bf16.msra.mxu1 %v403_v11  ;;  %p481_p4 = por %p480_p3, %p479_p2 }
  0x33   :  { %367 = vmatprep.subr.bf16.mxu1 %v404_v12 }
  0x34   :  { %p482_p5 = pnand %p481_p4, %p475_p1 }
  0x36   :  { %368 = vmatpush3.bf16.msra.mxu1 %v405_v13 }
  0x37   :  { %369 = vmatprep.subr.bf16.mxu1 %v406_v14 }
  0x3a   :  { %370 = vmatpush3.bf16.msra.mxu1 %v407_v15 }
  0x3b   :  { %371 = vmatprep.subr.bf16.mxu1 %v408_v16 }
  0x3e   :  { %372 = vmatpush3.bf16.msra.mxu1 %v409_v17 }
  0x3f   :  { %373 = vmatprep.subr.bf16.mxu1 %v410_v18 }
  0x42   :  { %374 = vmatpush3.bf16.msra.mxu1 %v411_v19 }
  0x43   :  { %375 = vmatprep.subr.bf16.mxu1 %v412_v20 }
  0x46   :  { %376 = vmatpush3.bf16.msra.mxu1 %v413_v21 }
  0xef   :  { %v136_v29 = vpop.f32.mrf.mxu0 }
  0xf0   :  { %v137_v30 = vadd.f32 %v136_v29, %v71_v27 }
  0xf1   :  { %v138_v31 = vpop.f32.mrf.mxu0 }
  0xf2   :  { %v139_v32 = vadd.f32 %v138_v31, %v75_v28  ;;  %v143_v33 = vmax.f32 %v137_v30, 0.0 }
  0xf3   :  { %v140_v34 = vpop.f32.mrf.mxu0 }
  0xf4   :  { %v144_v35 = vmax.f32 %v139_v32, 0.0  ;;  %v145_v38 = vpack.c.bf16 %v143_v33, %v143_v33 }
  0xf5   :  { %v141_v36 = vpop.f32.mrf.mxu0 }
  0xf6   :  { %v146_v37 = vpack.c.bf16 %v144_v35, %v144_v35 }
  0xf8   :  { %314 = vmatprep.mubr.bf16.mxu1 %v146_v37 }
  0xf9   :  { %315 = vmatmul.mubr.bf16.vlgmr.msra.gmra.mxu1 %v145_v38 }
 0x1b9   :  { %v377_v39 = vpop.f32.mrf.mxu1 }
 0x1bb   :  { %v378_v41 = vpop.f32.mrf.mxu1 }
 0x1bc   :  { %v379_v42 = vadd.f32 %v378_v41, %v377_v39 }
 0x1bd   :  { %v380_v43 = vpop.f32.mrf.mxu1 }
 0x1be   :  { %v317_v44 = vadd.f32 %v379_v42, %v344_v40 }
 0x1bf   :  { %v381_v45 = vpop.f32.mrf.mxu1 }
 0x1c0   :  { %322 = vst [vmem:[#allocation8] sm:$0xff] %v317_v44 }
 0x1c1   :  { %485 = shalt.err (!%p482_p5)
}
 0x1c2   :  { %332 = dma.vmem_to_hbm [thread:$0]  %s330_s13, 128, %s562_s5, [#allocation4]  }
 0x1c3   :  { %498 = dma.done.wait [#allocation4], 128  }
 0x1c4   :  { %499 = vsyncadd [#allocation4], 4294967168 }
 0x1c5   :  { %336 = vsyncpa [#allocation3], 1 }
 0x1c6   :  { %337 = vsyncpa [#allocation6], 1 }
 0x1c7   :  { %338 = vsyncpa [#allocation4], 1 }

</bundles_post_ra>
